<compile_context>
chip_gen: v5e
topology: v5e:2x2
jax: 0.10.0
libtpu: 0.0.40
codegen_flags: <defaults>
</compile_context>

<pallas_src>
import jax
import jax.numpy as jnp
from jax.experimental import pallas as pl
from jax.experimental.pallas import tpu as pltpu

D_IN = 2 * 32      # 64
H_ATT = 100
H_CLS = 48
T_SEQ = 8          # small sequence length for the example input
PACK_N = 128       # lane-dense packed width (col 0: fused classifier, 1..100: att1)


def discriminator_kernel(ht_ref, wpack_ref, bpack_ref, w2row_ref, scal_ref, out_ref):
    ht = ht_ref[...]                                                   # (T, 64) f32

    # Single lane-dense MXU matmul:
    #   col 0        -> v_t  = ht_t @ (wf1 @ wf2)      (bias col is zero)
    #   cols 1..100  -> att1 pre-activation (ht @ w1 + b1)
    #   cols 101..   -> zero padding
    p = (jnp.dot(ht, wpack_ref[...], preferred_element_type=jnp.float32)
         + bpack_ref[...])                                             # (T, 128)

    v = p[:, 0:1]                                                      # (T, 1)

    # att1 nonlinearity on the whole tile (padded/extra lanes are zeroed by w2row).
    th = jnp.tanh(p)                                                   # (T, 128)

    # att2 as a VPU multiply + lane reduce (no second MXU push).
    b2 = scal_ref[0]
    alp = jnp.tanh(jnp.sum(th * w2row_ref[...], axis=-1, keepdims=True) + b2)  # (T, 1)

    # softmax over T folded into a weighted average of v.
    m = jnp.max(alp, axis=0, keepdims=True)
    e = jnp.exp(alp - m)                                               # (T, 1)
    num = jnp.sum(e * v, axis=0, keepdims=True)                        # (1, 1)
    den = jnp.sum(e, axis=0, keepdims=True)                            # (1, 1)

    b_fused = scal_ref[1]
    out_ref[...] = num / den + b_fused                                 # (1, 1)


def pack_params(params):
    """Fold fc1·fc2, pack att1 + fused classifier into one lane-dense operand."""
    w1, b1, w2, b2, wf1, bf1, wf2, bf2 = params

    w_fused = wf1 @ wf2                         # (64, 1)
    b_fused = (bf1 @ wf2 + bf2)[0, 0]           # scalar

    wpack = jnp.zeros((D_IN, PACK_N), jnp.float32)
    wpack = wpack.at[:, 0:1].set(w_fused)
    wpack = wpack.at[:, 1:1 + H_ATT].set(w1)

    bpack = jnp.zeros((1, PACK_N), jnp.float32)          # col 0 stays zero!
    bpack = bpack.at[:, 1:1 + H_ATT].set(b1)

    w2row = jnp.zeros((1, PACK_N), jnp.float32)          # zeros outside 1..100
    w2row = w2row.at[:, 1:1 + H_ATT].set(w2[:, 0])

    scalars = jnp.array([b2[0, 0], b_fused], jnp.float32)  # SMEM: [b2, b_fused]
    return wpack, bpack, w2row, scalars


def discriminator_forward(ht, packed):
    """ht: (T, 64) float32. Returns (1, 1) float32, matching PyTorch output."""
    wpack, bpack, w2row, scalars = packed
    vmem = pl.BlockSpec(memory_space=pltpu.MemorySpace.VMEM)
    smem = pl.BlockSpec(memory_space=pltpu.MemorySpace.SMEM)

    T = ht.shape[0]
    cost = pl.CostEstimate(
        flops=2 * T * D_IN * PACK_N + 6 * T * PACK_N,
        transcendentals=T * (PACK_N + 2),
        bytes_accessed=4 * (ht.size + wpack.size + bpack.size
                            + w2row.size + scalars.size + 1),
    )

    return pl.pallas_call(
        discriminator_kernel,
        out_shape=jax.ShapeDtypeStruct((1, 1), jnp.float32),
        in_specs=[vmem, vmem, vmem, vmem, smem],
        out_specs=vmem,
        cost_estimate=cost,
    )(ht, wpack, bpack, w2row, scalars)


def init_params(key):
    """Deterministic init (PyTorch-Linear-style uniform bounds), weights stored
    as (in_features, out_features); biases kept 2D (1, out)."""
    ks = jax.random.split(key, 8)

    def lin(kw, kb, fan_in, fan_out):
        bound = 1.0 / jnp.sqrt(jnp.float32(fan_in))
        w = jax.random.uniform(kw, (fan_in, fan_out), jnp.float32, -bound, bound)
        b = jax.random.uniform(kb, (1, fan_out), jnp.float32, -bound, bound)
        return w, b

    w1, b1 = lin(ks[0], ks[1], D_IN, H_ATT)     # att1: Linear(64, 100)
    w2, b2 = lin(ks[2], ks[3], H_ATT, 1)        # att2: Linear(100, 1)
    wf1, bf1 = lin(ks[4], ks[5], D_IN, H_CLS)   # fc1 : Linear(64, 48)
    wf2, bf2 = lin(ks[6], ks[7], H_CLS, 1)      # fc2 : Linear(48, 1)
    return (w1, b1, w2, b2, wf1, bf1, wf2, bf2)


def reference_forward(ht, params):
    """Pure-JAX reference mirroring the PyTorch forward (unfused), for validation."""
    w1, b1, w2, b2, wf1, bf1, wf2, bf2 = params
    ha = jnp.tanh(ht @ w1 + b1)                  # (T, 100)
    alp = jnp.tanh(ha @ w2 + b2)                 # (T, 1)
    al = jax.nn.softmax(alp, axis=0)             # softmax over T
    u = (al * ht).sum(axis=0, keepdims=True)     # (1, 64)
    return (u @ wf1 + bf1) @ wf2 + bf2           # (1, 1)


if __name__ == "__main__":
    key = jax.random.PRNGKey(0)
    k_param, k_x = jax.random.split(key)

    params = init_params(k_param)
    packed = pack_params(params)
    ht = jax.random.normal(k_x, (T_SEQ, D_IN), jnp.float32)   # (8, 64)

    out = discriminator_forward(ht, packed)
    out = jax.block_until_ready(out)

    ref = reference_forward(ht, params)
    assert out.shape == (1, 1)
    assert jnp.allclose(out, ref, atol=1e-5, rtol=1e-5), (out, ref)

    print("KERNEL_OK")
</pallas_src>

<mosaic_0001>
module attributes {stable_mosaic.version = 11 : i64} {
  func.func @discriminator_kernel(%arg0: memref<8x64xf32, #tpu.memory_space<vmem>>, %arg1: memref<64x128xf32, #tpu.memory_space<vmem>>, %arg2: memref<1x128xf32, #tpu.memory_space<vmem>>, %arg3: memref<1x128xf32, #tpu.memory_space<vmem>>, %arg4: memref<2xf32, #tpu.memory_space<smem>>, %arg5: memref<1x1xf32, #tpu.memory_space<vmem>>) attributes {dimension_semantics = [], scalar_prefetch = 0 : i64, scratch_operands = 0 : i64, tpu.core_type = #tpu.core_type<tc>} {
    %c0 = arith.constant 0 : index
    %c0_0 = arith.constant 0 : index
    %0 = vector.load %arg0[%c0, %c0_0] : memref<8x64xf32, #tpu.memory_space<vmem>>, vector<8x64xf32>
    %c0_1 = arith.constant 0 : index
    %c0_2 = arith.constant 0 : index
    %1 = vector.load %arg1[%c0_1, %c0_2] : memref<64x128xf32, #tpu.memory_space<vmem>>, vector<64x128xf32>
    %cst = arith.constant dense<0.000000e+00> : vector<8x128xf32>
    %2 = tpu.matmul %0, %1, %cst {dimension_numbers = #tpu.dot_dimension_numbers<[1], [0], [0], [1], [0, 0, 1, 1], [], []>} : vector<8x64xf32>, vector<64x128xf32>, vector<8x128xf32> -> vector<8x128xf32>
    %c0_3 = arith.constant 0 : index
    %c0_4 = arith.constant 0 : index
    %3 = vector.load %arg2[%c0_3, %c0_4] : memref<1x128xf32, #tpu.memory_space<vmem>>, vector<1x128xf32>
    %4 = vector.broadcast %3 : vector<1x128xf32> to vector<8x128xf32>
    %5 = arith.addf %2, %4 : vector<8x128xf32>
    %6 = vector.extract_strided_slice %5 {offsets = [0, 0], sizes = [8, 1], strides = [1, 1]} : vector<8x128xf32> to vector<8x1xf32>
    %7 = math.tanh %5 : vector<8x128xf32>
    %c0_5 = arith.constant 0 : index
    %8 = memref.load %arg4[%c0_5] : memref<2xf32, #tpu.memory_space<smem>>
    %c0_6 = arith.constant 0 : index
    %c0_7 = arith.constant 0 : index
    %9 = vector.load %arg3[%c0_6, %c0_7] : memref<1x128xf32, #tpu.memory_space<vmem>>, vector<1x128xf32>
    %10 = vector.broadcast %9 : vector<1x128xf32> to vector<8x128xf32>
    %11 = arith.mulf %7, %10 : vector<8x128xf32>
    %cst_8 = arith.constant dense<0.000000e+00> : vector<8xf32>
    %12 = vector.multi_reduction <add>, %11, %cst_8 [1] : vector<8x128xf32> to vector<8xf32>
    %13 = vector.shape_cast %12 : vector<8xf32> to vector<8x1xf32>
    %14 = vector.broadcast %8 : f32 to vector<8x1xf32>
    %15 = arith.addf %13, %14 : vector<8x1xf32>
    %16 = math.tanh %15 : vector<8x1xf32>
    %cst_9 = arith.constant dense<0xFF800000> : vector<1xf32>
    %17 = vector.multi_reduction <maximumf>, %16, %cst_9 [0] : vector<8x1xf32> to vector<1xf32>
    %18 = vector.shape_cast %17 : vector<1xf32> to vector<1x1xf32>
    %19 = vector.broadcast %18 : vector<1x1xf32> to vector<8x1xf32>
    %20 = arith.subf %16, %19 : vector<8x1xf32>
    %21 = math.exp %20 : vector<8x1xf32>
    %22 = arith.mulf %21, %6 : vector<8x1xf32>
    %cst_10 = arith.constant dense<0.000000e+00> : vector<1xf32>
    %23 = vector.multi_reduction <add>, %22, %cst_10 [0] : vector<8x1xf32> to vector<1xf32>
    %24 = vector.shape_cast %23 : vector<1xf32> to vector<1x1xf32>
    %cst_11 = arith.constant dense<0.000000e+00> : vector<1xf32>
    %25 = vector.multi_reduction <add>, %21, %cst_11 [0] : vector<8x1xf32> to vector<1xf32>
    %26 = vector.shape_cast %25 : vector<1xf32> to vector<1x1xf32>
    %c1 = arith.constant 1 : index
    %27 = memref.load %arg4[%c1] : memref<2xf32, #tpu.memory_space<smem>>
    %28 = arith.divf %24, %26 : vector<1x1xf32>
    %29 = vector.broadcast %27 : f32 to vector<1x1xf32>
    %30 = arith.addf %28, %29 : vector<1x1xf32>
    %c0_12 = arith.constant 0 : index
    %c0_13 = arith.constant 0 : index
    %31 = vector.load %arg5[%c0_12, %c0_13] : memref<1x1xf32, #tpu.memory_space<vmem>>, vector<1x1xf32>
    tpu.vector_store %arg5[%c0_12, %c0_13], %30 {strides = array<i32>} : memref<1x1xf32, #tpu.memory_space<vmem>>, vector<1x1xf32>,
    return
  }
}

</mosaic_0001>

<bundles_post_ra>
// kernel: tpu_custom_call.1
= control target key start
LH: loop header
LB: loop body
LE: loop exit
PB: predicated region body
PF: predicated region fallthrough
CT: control target
= control target key end

     0   :  { %10 = vsyncpa [#allocation3], 0  ;;  %s340_s0 = inlined_call_operand.hbm [shape: f32[8,64], index: 0, kind: input, shape index: {}]   ;;  %s341_s1 = inlined_call_operand.hbm [shape: f32[64,128], index: 1, kind: input, shape index: {}]   ;;  %s342_s2 = inlined_call_operand.vmem [shape: f32[1,128], index: 2, kind: input, shape index: {}]   ;;  %s343_s3 = inlined_call_operand.vmem [shape: f32[1,128], index: 3, kind: input, shape index: {}]   ;;  %s344_s4 = inlined_call_operand.vmem [shape: f32[2], index: 4, kind: input, shape index: {}]   ;;  %s345_s5 = inlined_call_operand.hbm [shape: f32[1,1], index: 5, kind: output, shape index: {}]  }
   0x1   :  { %11 = vsyncpa [#allocation7], 0 }
   0x2   :  { %12 = vsyncpa [#allocation5], 0 }
   0x3   :  { %13 = vsyncpa [#allocation4], 0  ;;  %s19_s20 = sshll.u32 %s340_s0, 4  ;;  %s286_s21 = smov [#allocation2]   ;;  %s20_s20 = int_to_ptr.hbm [resolvable:$true] %s19_s20 }
   0x4   :  { %s21_s22 = sshll.u32 %s286_s21, 4  ;;  %s29_s25 = sshll.u32 %s341_s1, 4  ;;  %s22_s22 = int_to_ptr.vmem [resolvable:$true] %s21_s22  ;;  %s30_s25 = int_to_ptr.hbm [resolvable:$true] %s29_s25 }
   0x5   :  { %24 = dma.hbm_to_vmem [thread:$0]  %s20_s20, 128, %s22_s22, [#allocation3]  }
   0x6   :  { %s287_s26 = smov [#allocation6]   ;;  %s288_s28 = smov 128  }
   0x7   :  { %s31_s27 = sshll.u32 %s287_s26, 4  ;;  %s289_s29 = smov 8   ;;  %s32_s27 = int_to_ptr.vmem [resolvable:$true] %s31_s27 }
   0x8   :  { %37 = dma.hbm_to_vmem [thread:$0]  %s30_s25, 1024, %s32_s27, [#allocation7], %s288_s28, %s288_s28, %s289_s29  }
   0x9   :  { %s47_s0 = sshll.u32 %s344_s4, 4  ;;  %s290_s7 = smov [#allocation8]   ;;  %s48_s0 = int_to_ptr.vmem [resolvable:$true] %s47_s0 }
   0xa   :  { %50 = dma.vmem_to_smem %s48_s0, 16, %s290_s7, [#allocation5]  }
   0xb   :  { %278 = dma.done.wait [#allocation3], 128  }
   0xc   :  { %279 = vsyncadd [#allocation3], 4294967168 }
   0xd   :  { %280 = dma.done.wait [#allocation7], 1024  }
   0xe   :  { %281 = vsyncadd [#allocation7], 4294966272 }
   0xf   :  { %282 = dma.done.wait [#allocation5], 16  }
  0x10   :  { %283 = vsyncadd [#allocation5], 4294967280 }
  0x11   :  { %63 = sfence }
  0x12   :  { %v72_v0 = vld [vmem:[#allocation6 + $0x38] sm:$0xff]  ;;  %v71_v1 = vld [vmem:[#allocation6 + $0x30] sm:$0xff]  ;;  %v70_v2 = vld [vmem:[#allocation6 + $0x28] sm:$0xff]  ;;  %vm77_vm0 = vcmask 523264   ;;  %s102_s10 = sld [smem:[#allocation8]]  ;;  %vm123_vm1 = vcmask 7168  }
  0x13   :  { %89 = vmatpush.msra.mxu0 %v72_v0  ;;  %v69_v3 = vld [vmem:[#allocation6 + $0x20] sm:$0xff]  ;;  %v68_v4 = vld [vmem:[#allocation6 + $0x18] sm:$0xff]  ;;  %v67_v5 = vld [vmem:[#allocation6 + $0x10] sm:$0xff]  ;;  %s164_s14 = sshll.u32 %s345_s5, 4  ;;  %vm155_vm6 = vcmask 0   ;;  %s165_s14 = int_to_ptr.hbm [resolvable:$true] %s164_s14 }
  0x14   :  { %v66_v6 = vld [vmem:[#allocation6 + $0x8] sm:$0xff]  ;;  %v65_v7 = vld [vmem:[#allocation6] sm:$0xff]  ;;  %v64_v8 = vld [vmem:[#allocation2] sm:$0xff] }
  0x15   :  { %90 = vmatpush.msra.mxu0 %v71_v1  ;;  %v184_v9 = vld [vmem:[%s342_s2] ss:$0 sm:$0xff]  ;;  %s177_s2 = sld [smem:[#allocation8 + $0x1]] }
  0x16   :  { %v185_v12 = vld [vmem:[%s343_s3] ss:$0 sm:$0xff]  ;;  %s291_s3 = smov [#allocation9]  }
  0x17   :  { %91 = vmatpush.msra.mxu0 %v70_v2  ;;  %s162_s11 = sshll.u32 %s291_s3, 4  ;;  %s163_s11 = int_to_ptr.vmem [resolvable:$true] %s162_s11 }
  0x18   :  { %v110_v15 = vstv %s102_s10 }
  0x19   :  { %92 = vmatpush.msra.mxu0 %v69_v3 }
  0x1b   :  { %93 = vmatpush.msra.mxu0 %v68_v4  ;;  %v153_v52 = vstv %s177_s2 }
  0x1d   :  { %94 = vmatpush.msra.mxu0 %v67_v5 }
  0x1f   :  { %95 = vmatpush.msra.mxu0 %v66_v6 }
  0x21   :  { %96 = vmatpush.msra.mxu0 %v65_v7 }
  0x22   :  { %176 = vmatmul.msk.f32.vlgmr.msra.gmra.mxu0 %vm77_vm0, %v64_v8 }
  0x9f   :  { %v98_v10 = vpop.f32.mrf.mxu0 }
  0xa0   :  { %v99_v11 = vadd.f32 %v184_v9, %v98_v10 }
  0xa2   :  { %186 = vtanh.f32 %v99_v11 }
  0xa8   :  { %v187_v13 = vpop.eup %186 }
  0xa9   :  { %v107_v14 = vmul.f32 %v187_v13, %v185_v12 }
  0xab   :  { %108 = vadd.xlane.f32.xlu0 %v107_v14 }
 0x11e   :  { %v109_v16 = vpop.xlane.xlu0 %108 }
 0x11f   :  { %v111_v17 = vadd.f32 %v110_v15, %v109_v16 }
 0x121   :  { %188 = vtanh.f32 %v111_v17 }
 0x127   :  { %v189_v18 = vpop.eup %188 }
 0x128   :  { %v113_v19 = vrot.slane %v189_v18, 4 }
 0x12a   :  { %v114_v20 = vmax.f32 %v189_v18, %v113_v19 }
 0x12c   :  { %v115_v21 = vrot.slane %v114_v20, 2 }
 0x12e   :  { %v116_v22 = vmax.f32 %v114_v20, %v115_v21 }
 0x130   :  { %v117_v23 = vrot.slane %v116_v22, 1 }
 0x132   :  { %v118_v24 = vmax.f32 %v116_v22, %v117_v23 }
 0x134   :  { %v119_v25 = vsub.f32 %v189_v18, %v118_v24 }
 0x136   :  { %v120_v26 = vmul.f32 1.442695, %v119_v25 }
 0x138   :  { %190 = vpow2.f32 %v120_v26 }
 0x13e   :  { %v191_v27 = vpop.eup %190 }
 0x13f   :  { %v122_v28 = vmul.f32 %v191_v27, %v99_v11  ;;  %v131_v29 = vrot.slane %v191_v27, 4 }
 0x141   :  { %v132_v30 = vadd.f32 %v191_v27, %v131_v29  ;;  %v124_v31 = vsel %vm123_vm1, %v122_v28, 0.0 }
 0x142   :  { %v125_v34 = vrot.slane %v124_v31, 4 }
 0x143   :  { %v133_v32 = vrot.slane %v132_v30, 2 }
 0x144   :  { %v126_v37 = vadd.f32 %v125_v34, %v124_v31 }
 0x145   :  { %v134_v33 = vadd.f32 %v133_v32, %v132_v30 }
 0x146   :  { %v127_v38 = vrot.slane %v126_v37, 2 }
 0x147   :  { %v135_v35 = vrot.slane %v134_v33, 1 }
 0x148   :  { %v128_v40 = vadd.f32 %v127_v38, %v126_v37 }
 0x149   :  { %v136_v36 = vadd.f32 %v135_v35, %v134_v33 }
 0x14a   :  { %v129_v44 = vrot.slane %v128_v40, 1 }
 0x14b   :  { %192 = vrcp.f32 %v136_v36  ;;  %v149_v43 = vand.u32 2147483648, %v136_v36  ;;  %v147_v46 = vand.u32 2147483647, %v136_v36  ;;  %vm143_vm3 = vweird.f32 %v136_v36 }
 0x14c   :  { %v130_v49 = vadd.f32 %v129_v44, %v128_v40 }
 0x14d   :  { %v150_v48 = vor.u32 1.1754944e-38, %v149_v43  ;;  %vm148_vm5 = vcmp.eq.f32.partialorder %v147_v46, 8.507059e+37 }
 0x151   :  { %v193_v39 = vpop.eup %192 }
 0x152   :  { %v139_v41 = vmul.f32 %v193_v39, %v136_v36  ;;  %vm144_vm2 = vweird.f32 %v193_v39 }
 0x153   :  { %vm145_vm4 = vmor %vm143_vm3, %vm144_vm2 }
 0x154   :  { %v140_v42 = vsub.f32 1.0, %v139_v41 }
 0x156   :  { %v141_v45 = vmul.f32 %v193_v39, %v140_v42 }
 0x158   :  { %v142_v47 = vadd.f32 %v193_v39, %v141_v45 }
 0x15a   :  { %v146_v50 = vsel %vm145_vm4, %v193_v39, %v142_v47 }
 0x15b   :  { %v151_v51 = vsel %vm148_vm5, %v150_v48, %v146_v50 }
 0x15c   :  { %v152_v53 = vmul.f32 %v151_v51, %v130_v49 }
 0x15e   :  { %v154_v54 = vadd.f32 %v153_v52, %v152_v53 }
 0x160   :  { %156 = vst.msk [vmem:[#allocation9] sm:$0x1] %vm155_vm6, %v154_v54 }
 0x161   :  { %167 = dma.vmem_to_hbm [thread:$0]  %s163_s11, 16, %s165_s14, [#allocation4]  }
 0x162   :  { %284 = dma.done.wait [#allocation4], 16  }
 0x163   :  { %285 = vsyncadd [#allocation4], 4294967280 }
 0x164   :  { %172 = vsyncpa [#allocation3], 1 }
 0x165   :  { %173 = vsyncpa [#allocation7], 1 }
 0x166   :  { %174 = vsyncpa [#allocation4], 1 }
 0x167   :  { %175 = vsyncpa [#allocation5], 1 }

</bundles_post_ra>
